<compile_context>
chip_gen: v7x
topology: tpu7x:2x2x1
jax: 0.10.0
libtpu: 0.0.40
codegen_flags: <defaults>
</compile_context>

<pallas_src>
import math

import jax
import jax.numpy as jnp
from jax.experimental import pallas as pl
from jax.experimental.pallas import tpu as pltpu

_VMEM_TILE_BUDGET = 24 * 1024 * 1024  # safe on v5e/v6e (128 MiB) and v7x (64 MiB/TC)


def _rowsum_kernel(u_ref, v_ref, o_ref):
    """General path: one (TM, D) tile -> (1, TM) lane-dense row sums."""
    diff = u_ref[...].astype(jnp.float32) - v_ref[...].astype(jnp.float32)
    s = jnp.sum(diff * diff, axis=-1)             # (TM,) f32 row sums
    o_ref[...] = s[None, :].astype(o_ref.dtype)   # unmasked lane-major store


def _packed_kernel(u_ref, v_ref, s_ref, o_ref):
    """Small-D path: (TM, G*D) lane-dense tile; segment sums via MXU matmul."""
    diff = u_ref[...].astype(jnp.float32) - v_ref[...].astype(jnp.float32)
    o_ref[...] = jnp.dot(
        diff * diff, s_ref[...],
        preferred_element_type=jnp.float32,
        precision=jax.lax.Precision.HIGHEST,      # exact f32 segment sums
    ).astype(o_ref.dtype)


def _pick_rows(n_rows, row_width, itemsize, align):
    """Rows per grid step: biggest tile inside the VMEM budget, `align`-aligned."""
    # 2 inputs x 2 pipeline buffers (itemsize) + ~2 f32 temps per element.
    per_row = row_width * (4 * itemsize + 8)
    t = _VMEM_TILE_BUDGET // max(per_row, 1)
    t = max(align, min(t, 16384))
    t = (t // align) * align
    # Keep >= 4 grid steps (pipeline overlap / megacore) when the problem is big.
    while t >= 2048 and pl.cdiv(n_rows, t) < 4:
        t = max(align, ((t // 2) // align) * align)
    if n_rows <= t:  # small problem: one (padded) block, no oversized tile
        t = max(align, ((n_rows + align - 1) // align) * align)
    return int(t)


@jax.jit
def euclidean_distance(u, v):
    """Pallas TPU equivalent of th.sum(th.pow(u - v, 2), dim=-1)."""
    assert u.shape == v.shape, "u and v must have the same shape"
    *lead, D = u.shape
    lead = tuple(lead)
    M = 1
    for s in lead:
        M *= s
    out_dtype = jnp.result_type(u.dtype, v.dtype)

    if M == 0 or D == 0:
        return jnp.zeros(lead, out_dtype)

    itemsize = jnp.dtype(u.dtype).itemsize
    out_itemsize = jnp.dtype(out_dtype).itemsize

    # Minimal packing factor that makes the packed lane width a multiple of 128.
    g = 128 // math.gcd(D, 128)

    if g > 1 and M % g == 0:
        # ---------- packed small-D path: fully lane-dense reads & writes ----------
        mp, w = M // g, g * D
        u2 = u.reshape(mp, w)                     # contiguous reshape, free
        v2 = v.reshape(mp, w)
        # (w, g) 0/1 segment-sum matrix; constant index_map -> fetched once.
        seg = (jnp.arange(w, dtype=jnp.int32)[:, None] // D
               == jnp.arange(g, dtype=jnp.int32)[None, :]).astype(jnp.float32)

        tm = _pick_rows(mp, w, itemsize, align=8)
        nt = pl.cdiv(mp, tm)
        est = (4 * tm * w * itemsize + 2 * tm * w * 4
               + 2 * w * g * 4 + 4 * tm * g * out_itemsize)
        vmem_limit = int(min(max(2 * est, 32 << 20), 56 << 20))

        out = pl.pallas_call(
            _packed_kernel,
            out_shape=jax.ShapeDtypeStruct((mp, g), out_dtype),
            grid_spec=pltpu.PrefetchScalarGridSpec(
                num_scalar_prefetch=0,
                grid=(nt,),
                in_specs=[
                    pl.BlockSpec((tm, w), lambda i: (i, 0)),
                    pl.BlockSpec((tm, w), lambda i: (i, 0)),
                    pl.BlockSpec((w, g), lambda i: (0, 0)),
                ],
                out_specs=pl.BlockSpec((tm, g), lambda i: (i, 0)),
            ),
            compiler_params=pltpu.CompilerParams(
                dimension_semantics=("parallel",),
                vmem_limit_bytes=vmem_limit,
            ),
        )(u2, v2, seg)
        return out.reshape(lead)                  # (mp, g) rows match original order

    # ---------- general path: large row tiles, lane-dense (1, TM) output ----------
    u2 = u.reshape(M, D)
    v2 = v.reshape(M, D)
    tm = _pick_rows(M, D, itemsize, align=128)
    nt = pl.cdiv(M, tm)
    est = 4 * tm * D * itemsize + 2 * tm * D * 4 + 4 * tm * out_itemsize
    vmem_limit = int(min(max(2 * est, 32 << 20), 56 << 20))

    out = pl.pallas_call(
        _rowsum_kernel,
        out_shape=jax.ShapeDtypeStruct((1, nt * tm), out_dtype),
        grid_spec=pltpu.PrefetchScalarGridSpec(
            num_scalar_prefetch=0,
            grid=(nt,),
            in_specs=[
                pl.BlockSpec((tm, D), lambda i: (i, 0)),
                pl.BlockSpec((tm, D), lambda i: (i, 0)),
            ],
            out_specs=pl.BlockSpec((1, tm), lambda i: (0, i)),
        ),
        compiler_params=pltpu.CompilerParams(
            dimension_semantics=("parallel",),
            vmem_limit_bytes=vmem_limit,
        ),
    )(u2, v2)
    return out.reshape(-1)[:M].reshape(lead)      # drop boundary-block garbage


if __name__ == "__main__":
    root = jax.random.PRNGKey(0)

    def run_check(shape, seed, tol):
        k = jax.random.fold_in(root, seed)
        ku, kv = jax.random.split(k)
        u = jax.random.normal(ku, shape, dtype=jnp.float32)
        v = jax.random.normal(kv, shape, dtype=jnp.float32)
        out = jax.block_until_ready(euclidean_distance(u, v))
        ref = jnp.sum((u - v) ** 2, axis=-1)
        assert out.shape == ref.shape, (shape, out.shape, ref.shape)
        assert jnp.allclose(out, ref, atol=tol, rtol=tol), f"mismatch for {shape}"

    # Module-shaped input (batch=2, seq=8, hidden=32): packed path, single tile.
    run_check((2, 8, 32), seed=0, tol=1e-5)
    # Packed path, single padded tile (M not a multiple of the tile rows).
    run_check((1000, 32), seed=1, tol=1e-5)
    # Packed path, multiple tiles with a partial boundary block.
    run_check((50000, 32), seed=2, tol=1e-4)
    # General path (D multiple of 128), multiple tiles with a partial boundary block.
    run_check((9000, 256), seed=3, tol=1e-4)
    # General-path fallback: tiny M not divisible by the packing factor.
    run_check((13, 32), seed=4, tol=1e-5)

    print("KERNEL_OK")
</pallas_src>

<mosaic_0001>
module attributes {stable_mosaic.version = 11 : i64} {
  func.func @_packed_kernel(%arg0: i32, %arg1: memref<8x128xf32, #tpu.memory_space<vmem>>, %arg2: memref<8x128xf32, #tpu.memory_space<vmem>>, %arg3: memref<128x4xf32, #tpu.memory_space<vmem>>, %arg4: memref<8x4xf32, #tpu.memory_space<vmem>>) attributes {dimension_semantics = [#tpu.dimension_semantics<parallel>], iteration_bounds = array<i64: 1>, scalar_prefetch = 0 : i64, scratch_operands = 0 : i64, tpu.core_type = #tpu.core_type<tc>, window_params = [{transform_indices = @transform_0, window_bounds = array<i64: 8, 128>}, {transform_indices = @transform_1, window_bounds = array<i64: 8, 128>}, {pipeline_mode = #tpu.pipeline_mode<synchronous>, transform_indices = @transform_2, window_bounds = array<i64: 128, 4>}, {transform_indices = @transform_3, window_bounds = array<i64: 8, 4>}]} {
    %c0 = arith.constant 0 : index
    %c0_0 = arith.constant 0 : index
    %0 = vector.load %arg1[%c0, %c0_0] : memref<8x128xf32, #tpu.memory_space<vmem>>, vector<8x128xf32>
    %c0_1 = arith.constant 0 : index
    %c0_2 = arith.constant 0 : index
    %1 = vector.load %arg2[%c0_1, %c0_2] : memref<8x128xf32, #tpu.memory_space<vmem>>, vector<8x128xf32>
    %2 = arith.subf %0, %1 : vector<8x128xf32>
    %3 = arith.mulf %2, %2 : vector<8x128xf32>
    %c0_3 = arith.constant 0 : index
    %c0_4 = arith.constant 0 : index
    %4 = vector.load %arg3[%c0_3, %c0_4] : memref<128x4xf32, #tpu.memory_space<vmem>>, vector<128x4xf32>
    %cst = arith.constant dense<0.000000e+00> : vector<8x4xf32>
    %5 = tpu.matmul %3, %4, %cst {dimension_numbers = #tpu.dot_dimension_numbers<[1], [0], [0], [1], [0, 0, 1, 1], [], []>, precision = #tpu.contract_precision<fp32>} : vector<8x128xf32>, vector<128x4xf32>, vector<8x4xf32> -> vector<8x4xf32>
    %c0_5 = arith.constant 0 : index
    %c0_6 = arith.constant 0 : index
    %6 = vector.load %arg4[%c0_5, %c0_6] : memref<8x4xf32, #tpu.memory_space<vmem>>, vector<8x4xf32>
    tpu.vector_store %arg4[%c0_5, %c0_6], %5 {strides = array<i32>} : memref<8x4xf32, #tpu.memory_space<vmem>>, vector<8x4xf32>,
    return
  }
  func.func @transform_0(%arg0: i32) -> (i32, i32) {
    %c0_i32 = arith.constant 0 : i32
    %c0_i32_0 = arith.constant 0 : i32
    return %arg0, %c0_i32 : i32, i32
  }
  func.func @transform_1(%arg0: i32) -> (i32, i32) {
    %c0_i32 = arith.constant 0 : i32
    %c0_i32_0 = arith.constant 0 : i32
    return %arg0, %c0_i32 : i32, i32
  }
  func.func @transform_2(%arg0: i32) -> (i32, i32) {
    %c0_i32 = arith.constant 0 : i32
    %c0_i32_0 = arith.constant 0 : i32
    %c0_i32_1 = arith.constant 0 : i32
    return %c0_i32, %c0_i32_0 : i32, i32
  }
  func.func @transform_3(%arg0: i32) -> (i32, i32) {
    %c0_i32 = arith.constant 0 : i32
    %c0_i32_0 = arith.constant 0 : i32
    return %arg0, %c0_i32 : i32, i32
  }
}

</mosaic_0001>

<bundles_post_ra>
// kernel: euclidean_distance.1
= control target key start
LH: loop header
LB: loop body
LE: loop exit
PB: predicated region body
PF: predicated region fallthrough
CT: control target
= control target key end

     0   :  { %v1184_v3 = vmov 0.0|0.0   ;;  %vm1185_vm0 = vmmov 0   ;;  %v1186_v11 = vmov 0.0   ;;  %vm675_vm1 = vcmask 31744   ;;  %s1527_s0 = inlined_call_operand.vmem [shape: f32[4,128], index: 0, kind: input, shape index: {}]   ;;  %s1528_s1 = inlined_call_operand.vmem [shape: f32[4,128], index: 1, kind: input, shape index: {}]   ;;  %s1529_s2 = inlined_call_operand.vmem [shape: f32[128,4], index: 2, kind: input, shape index: {}]   ;;  %s1530_s3 = inlined_call_operand.vmem [shape: f32[4,4], index: 3, kind: output, shape index: {}]  }
   0x1   :  { %v18_v0 = vld [vmem:[%s1529_s2] sm:$0xff]  ;;  %v19_v1 = vld [vmem:[%s1529_s2 + $0x8] sm:$0xff]  ;;  %v20_v2 = vld [vmem:[%s1529_s2 + $0x10] sm:$0xff]  ;;  %1028 = vmatprep.subr.bf16.mxu1 %v1184_v3  ;;  %1100 = vmatprep.subr.bf16.mxu0 %v1184_v3 }
   0x2   :  { %v35_v4 = vand.u32 4294901760, %v18_v0  ;;  %v38_v5 = vand.u32 4294901760, %v19_v1  ;;  %v21_v6 = vld [vmem:[%s1529_s2 + $0x18] sm:$0xff]  ;;  %v41_v7 = vand.u32 4294901760, %v20_v2  ;;  %v1224_v9 = vld [vmem:[%s1529_s2 + $0x20] sm:$0xff]  ;;  %v1229_v10 = vld [vmem:[%s1529_s2 + $0x28] sm:$0xff]  ;;  %850 = vmatprep.mubr.msk.f32.mxu1 %vm1185_vm0, %v1186_v11  ;;  %955 = vmatprep.mubr.msk.f32.mxu0 %vm1185_vm0, %v1186_v11 }
   0x3   :  { %v44_v8 = vand.u32 4294901760, %v21_v6  ;;  %v47_v14 = vand.u32 4294901760, %v1224_v9  ;;  %v50_v15 = vand.u32 4294901760, %v1229_v10  ;;  %v1248_v16 = vld [vmem:[%s1529_s2 + $0x30] sm:$0xff]  ;;  %v1253_v17 = vld [vmem:[%s1529_s2 + $0x38] sm:$0xff]  ;;  %v14_v18 = vld [vmem:[%s1527_s0] sm:$0xff] }
   0x4   :  { %v1235_v12 = vpack.c.bf16 %v38_v5, %v35_v4  ;;  %v15_v19 = vld [vmem:[%s1528_s1] sm:$0xff]  ;;  %v53_v21 = vand.u32 4294901760, %v1248_v16  ;;  %v56_v22 = vand.u32 4294901760, %v1253_v17  ;;  %v1277_v24 = vld [vmem:[%s1529_s2 + $0x48] sm:$0xff]  ;;  %v1290_v30 = vld [vmem:[%s1529_s2 + $0x50] sm:$0xff]  ;;  %v1297_v32 = vsub.f32 %v18_v0, %v35_v4 }
   0x5   :  { %v1239_v13 = vpack.c.bf16 %v44_v8, %v41_v7  ;;  %v1263_v20 = vpack.c.bf16 %v50_v15, %v47_v14  ;;  %v1272_v23 = vld [vmem:[%s1529_s2 + $0x40] sm:$0xff]  ;;  %v16_v25 = vsub.f32 %v14_v18, %v15_v19  ;;  %v62_v29 = vand.u32 4294901760, %v1277_v24  ;;  %v1295_v31 = vld [vmem:[%s1529_s2 + $0x58] sm:$0xff]  ;;  %v1319_v39 = vld [vmem:[%s1529_s2 + $0x68] sm:$0xff] }
   0x6   :  { %1030 = vmatpush3.bf16.msra.mxu1 %v1235_v12  ;;  %1102 = vmatpush3.bf16.msra.mxu0 %v1235_v12  ;;  %v1281_v27 = vpack.c.bf16 %v56_v22, %v53_v21  ;;  %v59_v28 = vand.u32 4294901760, %v1272_v23  ;;  %v1301_v34 = vsub.f32 %v19_v1, %v38_v5  ;;  %v65_v36 = vand.u32 4294901760, %v1290_v30  ;;  %v1312_v38 = vld [vmem:[%s1529_s2 + $0x60] sm:$0xff]  ;;  %v1341_v46 = vld [vmem:[%s1529_s2 + $0x70] sm:$0xff]  ;;  %v1346_v47 = vld [vmem:[%s1529_s2 + $0x78] sm:$0xff] }
   0x7   :  { %1031 = vmatprep.subr.bf16.mxu1 %v1184_v3  ;;  %1103 = vmatprep.subr.bf16.mxu0 %v1184_v3  ;;  %v17_v26 = vmul.f32 %v16_v25, %v16_v25  ;;  %v68_v37 = vand.u32 4294901760, %v1295_v31  ;;  %v1321_v40 = vsub.f32 %v20_v2, %v41_v7  ;;  %v1323_v41 = vsub.f32 %v21_v6, %v44_v8 }
   0x8   :  { %v1305_v35 = vpack.c.bf16 %v62_v29, %v59_v28  ;;  %v71_v42 = vand.u32 4294901760, %v1312_v38  ;;  %v74_v45 = vand.u32 4294901760, %v1319_v39  ;;  %v128_v48 = vand.u32 4294901760, %v1297_v32 }
   0x9   :  { %v1299_v33 = vand.u32 4294901760, %v17_v26  ;;  %v1335_v44 = vpack.c.bf16 %v68_v37, %v65_v36  ;;  %v135_v49 = vand.u32 4294901760, %v1301_v34  ;;  %v1353_v50 = vsub.f32 %v1224_v9, %v47_v14 }
   0xa   :  { %1033 = vmatpush3.bf16.msra.mxu1 %v1239_v13  ;;  %1105 = vmatpush3.bf16.msra.mxu0 %v1239_v13  ;;  %v1356_v51 = vsub.f32 %v1229_v10, %v50_v15  ;;  %v77_v52 = vand.u32 4294901760, %v1341_v46  ;;  %v80_v53 = vand.u32 4294901760, %v1346_v47  ;;  %v142_v55 = vand.u32 4294901760, %v1321_v40 }
   0xb   :  { %1034 = vmatprep.subr.bf16.mxu1 %v1184_v3  ;;  %1106 = vmatprep.subr.bf16.mxu0 %v1184_v3  ;;  %v1327_v43 = vsub.f32 %v17_v26, %v1299_v33  ;;  %v1368_v56 = vpack.c.bf16 %v74_v45, %v71_v42  ;;  %v129_v57 = vsub.f32 %v1297_v32, %v128_v48  ;;  %v149_v59 = vand.u32 4294901760, %v1323_v41 }
   0xc   :  { %v136_v58 = vsub.f32 %v1301_v34, %v135_v49  ;;  %v1376_v60 = vsub.f32 %v1248_v16, %v53_v21  ;;  %v1379_v61 = vsub.f32 %v1253_v17, %v56_v22  ;;  %v143_v63 = vsub.f32 %v1321_v40, %v142_v55 }
   0xd   :  { %v117_v54 = vand.u32 4294901760, %v1327_v43  ;;  %v156_v0 = vand.u32 4294901760, %v1353_v50  ;;  %v163_v1 = vand.u32 4294901760, %v1356_v51  ;;  %v1391_v2 = vpack.c.bf16 %v80_v53, %v77_v52 }
   0xe   :  { %1036 = vmatpush3.bf16.msra.mxu1 %v1263_v20  ;;  %1108 = vmatpush3.bf16.msra.mxu0 %v1263_v20  ;;  %v130_v4 = vand.u32 4294901760, %v129_v57  ;;  %v137_v5 = vand.u32 4294901760, %v136_v58  ;;  %v150_v6 = vsub.f32 %v1323_v41, %v149_v59  ;;  %v1397_v7 = vsub.f32 %v1272_v23, %v59_v28 }
   0xf   :  { %1037 = vmatprep.subr.bf16.mxu1 %v1184_v3  ;;  %1109 = vmatprep.subr.bf16.mxu0 %v1184_v3  ;;  %v118_v62 = vsub.f32 %v1327_v43, %v117_v54  ;;  %v1400_v8 = vsub.f32 %v1277_v24, %v62_v29  ;;  %v1125_v9 = vpack.c.bf16 %v135_v49, %v128_v48  ;;  %v144_v14 = vand.u32 4294901760, %v143_v63 }
  0x10   :  { %v157_v15 = vsub.f32 %v1353_v50, %v156_v0  ;;  %v164_v16 = vsub.f32 %v1356_v51, %v163_v1  ;;  %v1053_v17 = vpack.c.bf16 %v137_v5, %v130_v4  ;;  %v151_v18 = vand.u32 4294901760, %v150_v6 }
  0x11   :  { %v119_v10 = vand.u32 4294901760, %v118_v62  ;;  %v170_v19 = vand.u32 4294901760, %v1376_v60  ;;  %v177_v21 = vand.u32 4294901760, %v1379_v61  ;;  %v1413_v22 = vsub.f32 %v1290_v30, %v65_v36 }
  0x12   :  { %1039 = vmatpush3.bf16.msra.mxu1 %v1281_v27  ;;  %1111 = vmatpush3.bf16.msra.mxu0 %v1281_v27  ;;  %v1418_v23 = vsub.f32 %v1295_v31, %v68_v37  ;;  %v1128_v24 = vpack.c.bf16 %v149_v59, %v142_v55  ;;  %v158_v25 = vand.u32 4294901760, %v157_v15  ;;  %v165_v26 = vand.u32 4294901760, %v164_v16 }
  0x13   :  { %1040 = vmatprep.subr.bf16.mxu1 %v1184_v3  ;;  %1112 = vmatprep.subr.bf16.mxu0 %v1184_v3  ;;  %v184_v28 = vand.u32 4294901760, %v1397_v7  ;;  %v1056_v29 = vpack.c.bf16 %v151_v18, %v144_v14  ;;  %v171_v48 = vsub.f32 %v1376_v60, %v170_v19  ;;  %v178_v30 = vsub.f32 %v1379_v61, %v177_v21 }
  0x14   :  { %v191_v36 = vand.u32 4294901760, %v1400_v8  ;;  %v1429_v31 = vsub.f32 %v1312_v38, %v71_v42  ;;  %v1434_v37 = vsub.f32 %v1319_v39, %v74_v45  ;;  %v1131_v49 = vpack.c.bf16 %v163_v1, %v156_v0 }
  0x15   :  { %v198_v55 = vand.u32 4294901760, %v1413_v22  ;;  %v205_v57 = vand.u32 4294901760, %v1418_v23  ;;  %v1059_v38 = vpack.c.bf16 %v165_v26, %v158_v25  ;;  %v172_v42 = vand.u32 4294901760, %v171_v48 }
  0x16   :  { %1042 = vmatpush3.bf16.msra.mxu1 %v1305_v35  ;;  %1114 = vmatpush3.bf16.msra.mxu0 %v1305_v35  ;;  %v179_v58 = vand.u32 4294901760, %v178_v30  ;;  %v192_v39 = vsub.f32 %v1400_v8, %v191_v36  ;;  %v1449_v45 = vsub.f32 %v1341_v46, %v77_v52  ;;  %v1454_v59 = vsub.f32 %v1346_v47, %v80_v53 }
  0x17   :  { %1043 = vmatprep.subr.bf16.mxu1 %v1184_v3  ;;  %1115 = vmatprep.subr.bf16.mxu0 %v1184_v3  ;;  %v1134_v62 = vpack.c.bf16 %v177_v21, %v170_v19  ;;  %v199_v0 = vsub.f32 %v1413_v22, %v198_v55  ;;  %v206_v1 = vsub.f32 %v1418_v23, %v205_v57  ;;  %v212_v6 = vand.u32 4294901760, %v1429_v31 }
  0x18   :  { %v1062_v4 = vpack.c.bf16 %v179_v58, %v172_v42  ;;  %v193_v5 = vand.u32 4294901760, %v192_v39  ;;  %v219_v46 = vand.u32 4294901760, %v1434_v37  ;;  %v1137_v47 = vpack.c.bf16 %v191_v36, %v184_v28 }
  0x19   :  { %v200_v52 = vand.u32 4294901760, %v199_v0  ;;  %v207_v53 = vand.u32 4294901760, %v206_v1  ;;  %v213_v14 = vsub.f32 %v1429_v31, %v212_v6  ;;  %v233_v16 = vand.u32 4294901760, %v1454_v59 }
  0x1a   :  { %1045 = vmatpush3.bf16.msra.mxu1 %v1335_v44  ;;  %1117 = vmatpush3.bf16.msra.mxu0 %v1335_v44  ;;  %v220_v15 = vsub.f32 %v1434_v37, %v219_v46  ;;  %v1140_v18 = vpack.c.bf16 %v205_v57, %v198_v55 }
  0x1b   :  { %1046 = vmatprep.subr.bf16.mxu1 %v1184_v3  ;;  %1118 = vmatprep.subr.bf16.mxu0 %v1184_v3  ;;  %v214_v19 = vand.u32 4294901760, %v213_v14  ;;  %v234_v25 = vsub.f32 %v1454_v59, %v233_v16 }
  0x1c   :  { %v221_v21 = vand.u32 4294901760, %v220_v15 }
  0x1d   :  { %v235_v48 = vand.u32 4294901760, %v234_v25 }
  0x1e   :  { %1048 = vmatpush3.bf16.msra.mxu1 %v1368_v56  ;;  %1120 = vmatpush3.bf16.msra.mxu0 %v1368_v56  ;;  %v1071_v26 = vpack.c.bf16 %v221_v21, %v214_v19 }
  0x1f   :  { %1049 = vmatprep.subr.bf16.mxu1 %v1184_v3  ;;  %1121 = vmatprep.subr.bf16.mxu0 %v1184_v3 }
  0x22   :  { %1051 = vmatpush3.bf16.msra.mxu1 %v1391_v2  ;;  %1123 = vmatpush3.bf16.msra.mxu0 %v1391_v2 }
  0x23   :  { %1052 = vmatprep.subr.bf16.mxu1 %v1184_v3  ;;  %1124 = vmatprep.subr.bf16.mxu0 %v1184_v3 }
  0x25   :  { %851 = vmatmul.mubr.f32.vlgmr.msra.gmra.mrb[0].mxu1 %v119_v10  ;;  %956 = vmatmul.mubr.f32.vlgmr.msra.gmra.mrb[0].mxu0 %v117_v54  ;;  %v185_v54 = vsub.f32 %v1397_v7, %v184_v28  ;;  %v1143_v28 = vpack.c.bf16 %v219_v46, %v212_v6 }
  0x26   :  { %1054 = vmatpush3.bf16.msra.mxu1 %v1053_v17  ;;  %1126 = vmatpush3.bf16.msra.mxu0 %v1125_v9  ;;  %v226_v9 = vand.u32 4294901760, %v1449_v45  ;;  %v1068_v17 = vpack.c.bf16 %v207_v53, %v200_v52 }
  0x27   :  { %1055 = vmatprep.subr.bf16.mxu1 %v1184_v3  ;;  %1127 = vmatprep.subr.bf16.mxu0 %v1184_v3  ;;  %v186_v63 = vand.u32 4294901760, %v185_v54  ;;  %v1080_v54 = vpack.c.bf16 %v1323_v41, %v1321_v40 }
  0x28   :  { %885 = vmatprep.mubr.msk.f32.mxu1 %vm1185_vm0, %v1186_v11  ;;  %990 = vmatprep.mubr.msk.f32.mxu0 %vm1185_vm0, %v1186_v11  ;;  %v1146_v36 = vpack.c.bf16 %v233_v16, %v226_v9 }
  0x29   :  { %v1065_v10 = vpack.c.bf16 %v193_v5, %v186_v63 }
  0x2a   :  { %1057 = vmatpush3.bf16.msra.mxu1 %v1056_v29  ;;  %1129 = vmatpush3.bf16.msra.mxu0 %v1128_v24  ;;  %v227_v24 = vsub.f32 %v1449_v45, %v226_v9 }
  0x2b   :  { %1058 = vmatprep.subr.bf16.mxu1 %v1184_v3  ;;  %1130 = vmatprep.subr.bf16.mxu0 %v1184_v3 }
  0x2c   :  { %v228_v29 = vand.u32 4294901760, %v227_v24 }
  0x2e   :  { %1060 = vmatpush3.bf16.msra.mxu1 %v1059_v38  ;;  %1132 = vmatpush3.bf16.msra.mxu0 %v1131_v49  ;;  %v1074_v30 = vpack.c.bf16 %v235_v48, %v228_v29  ;;  %v1077_v49 = vpack.c.bf16 %v1301_v34, %v1297_v32  ;;  %v1083_v32 = vpack.c.bf16 %v1356_v51, %v1353_v50 }
  0x2f   :  { %1061 = vmatprep.subr.bf16.mxu1 %v1184_v3  ;;  %1133 = vmatprep.subr.bf16.mxu0 %v1184_v3 }
  0x32   :  { %1063 = vmatpush3.bf16.msra.mxu1 %v1062_v4  ;;  %1135 = vmatpush3.bf16.msra.mxu0 %v1134_v62 }
  0x33   :  { %1064 = vmatprep.subr.bf16.mxu1 %v1184_v3  ;;  %1136 = vmatprep.subr.bf16.mxu0 %v1184_v3 }
  0x36   :  { %1066 = vmatpush3.bf16.msra.mxu1 %v1065_v10  ;;  %1138 = vmatpush3.bf16.msra.mxu0 %v1137_v47 }
  0x37   :  { %1067 = vmatprep.subr.bf16.mxu1 %v1184_v3  ;;  %1139 = vmatprep.subr.bf16.mxu0 %v1184_v3 }
  0x3a   :  { %1069 = vmatpush3.bf16.msra.mxu1 %v1068_v17  ;;  %1141 = vmatpush3.bf16.msra.mxu0 %v1140_v18 }
  0x3b   :  { %1070 = vmatprep.subr.bf16.mxu1 %v1184_v3  ;;  %1142 = vmatprep.subr.bf16.mxu0 %v1184_v3 }
  0x3e   :  { %1072 = vmatpush3.bf16.msra.mxu1 %v1071_v26  ;;  %1144 = vmatpush3.bf16.msra.mxu0 %v1143_v28 }
  0x3f   :  { %1073 = vmatprep.subr.bf16.mxu1 %v1184_v3  ;;  %1145 = vmatprep.subr.bf16.mxu0 %v1184_v3 }
  0x42   :  { %1075 = vmatpush3.bf16.msra.mxu1 %v1074_v30  ;;  %1147 = vmatpush3.bf16.msra.mxu0 %v1146_v36 }
  0x43   :  { %1076 = vmatprep.subr.bf16.mxu1 %v1184_v3  ;;  %1148 = vmatprep.subr.bf16.mxu0 %v1184_v3 }
  0x45   :  { %886 = vmatmul.mubr.f32.vlgmr.msra.gmra.mrb[0].mxu1 %v1299_v33  ;;  %991 = vmatmul.mubr.f32.vlgmr.msra.gmra.mrb[0].mxu0 %v1299_v33 }
  0x46   :  { %1078 = vmatpush3.bf16.msra.mxu1 %v1077_v49  ;;  %1150 = vmatpush3.bf16.msra.mxu0 %v1235_v12  ;;  %v1086_v12 = vpack.c.bf16 %v1379_v61, %v1376_v60 }
  0x47   :  { %1079 = vmatprep.subr.bf16.mxu1 %v1184_v3  ;;  %1151 = vmatprep.subr.bf16.mxu0 %v1184_v3 }
  0x48   :  { %920 = vmatprep.mubr.msk.f32.mxu1 %vm1185_vm0, %v1186_v11  ;;  %1025 = vmatprep.mubr.msk.f32.mxu0 %vm1185_vm0, %v1186_v11  ;;  %v1089_v11 = vpack.c.bf16 %v1400_v8, %v1397_v7 }
  0x4a   :  { %1081 = vmatpush3.bf16.msra.mxu1 %v1080_v54  ;;  %1153 = vmatpush3.bf16.msra.mxu0 %v1239_v13  ;;  %v1092_v13 = vpack.c.bf16 %v1418_v23, %v1413_v22 }
  0x4b   :  { %1082 = vmatprep.subr.bf16.mxu1 %v1184_v3  ;;  %1154 = vmatprep.subr.bf16.mxu0 %v1184_v3 }
  0x4e   :  { %1084 = vmatpush3.bf16.msra.mxu1 %v1083_v32  ;;  %1156 = vmatpush3.bf16.msra.mxu0 %v1263_v20  ;;  %v1095_v20 = vpack.c.bf16 %v1434_v37, %v1429_v31 }
  0x4f   :  { %1085 = vmatprep.subr.bf16.mxu1 %v1184_v3  ;;  %1157 = vmatprep.subr.bf16.mxu0 %v1184_v3 }
  0x52   :  { %1087 = vmatpush3.bf16.msra.mxu1 %v1086_v12  ;;  %1159 = vmatpush3.bf16.msra.mxu0 %v1281_v27  ;;  %v1098_v27 = vpack.c.bf16 %v1454_v59, %v1449_v45 }
  0x53   :  { %1088 = vmatprep.subr.bf16.mxu1 %v1184_v3  ;;  %1160 = vmatprep.subr.bf16.mxu0 %v1184_v3 }
  0x56   :  { %1090 = vmatpush3.bf16.msra.mxu1 %v1089_v11  ;;  %1162 = vmatpush3.bf16.msra.mxu0 %v1305_v35 }
  0x57   :  { %1091 = vmatprep.subr.bf16.mxu1 %v1184_v3  ;;  %1163 = vmatprep.subr.bf16.mxu0 %v1184_v3 }
  0x5a   :  { %1093 = vmatpush3.bf16.msra.mxu1 %v1092_v13  ;;  %1165 = vmatpush3.bf16.msra.mxu0 %v1335_v44 }
  0x5b   :  { %1094 = vmatprep.subr.bf16.mxu1 %v1184_v3  ;;  %1166 = vmatprep.subr.bf16.mxu0 %v1184_v3 }
  0x5e   :  { %1096 = vmatpush3.bf16.msra.mxu1 %v1095_v20  ;;  %1168 = vmatpush3.bf16.msra.mxu0 %v1368_v56 }
  0x5f   :  { %1097 = vmatprep.subr.bf16.mxu1 %v1184_v3  ;;  %1169 = vmatprep.subr.bf16.mxu0 %v1184_v3 }
  0x62   :  { %1099 = vmatpush3.bf16.msra.mxu1 %v1098_v27  ;;  %1171 = vmatpush3.bf16.msra.mxu0 %v1391_v2 }
  0x65   :  { %921 = vmatmul.mubr.f32.vlgmr.msra.gmra.mrb[0].mxu1 %v1327_v43  ;;  %1026 = vmatmul.mubr.f32.vlgmr.msra.gmra.mrb[0].mxu0 %v1299_v33 }
 0x138   :  { %v376_v34 = vpop.f32.mrb[0].mxu1  ;;  %v671_v35 = vpop.f32.mrb[0].mxu0 }
 0x139   :  { %v1172_v40 = vadd.f32 %v671_v35, %v376_v34  ;;  %v922_v41 = vpop.f32.mrb[1].mxu1  ;;  %v1027_v44 = vpop.f32.mrb[1].mxu0 }
 0x13b   :  { %676 = vst.msk [vmem:[#allocation2] sm:$0xff] %vm675_vm1, %v1172_v40 }
 0x142   :  { %v694_v50 = vld [vmem:[#allocation2] sm:$0xf] }
 0x143   :  { %695 = vst [vmem:[%s1530_s3] sm:$0xf] %v694_v50 }

</bundles_post_ra>
